<compile_context>
chip_gen: v7x
topology: tpu7x:2x2x1
jax: 0.10.0
libtpu: 0.0.40
codegen_flags: <defaults>
</compile_context>

<pallas_src>
import functools
import math

import jax
import jax.numpy as jnp
from jax.experimental import pallas as pl
from jax.experimental.pallas import tpu as pltpu


# ----------------------------------------------------------------------------
# generation-aware VMEM limit
# ----------------------------------------------------------------------------

def _vmem_limit_bytes():
    cap = 64 * 1024 * 1024                      # conservative fallback (= v7x physical)
    try:
        info = pltpu.get_tpu_info()
        cap = int(getattr(info, "vmem_capacity_bytes", cap))
    except Exception:
        pass
    # ~75% of physical, capped: 96 MiB on 128-MiB v5e/v6e, 48 MiB on 64-MiB v7x.
    return max(32 * 1024 * 1024, min((cap * 3) // 4, 96 * 1024 * 1024))


_VMEM_LIMIT = _vmem_limit_bytes()


# ----------------------------------------------------------------------------
# helpers
# ----------------------------------------------------------------------------

_SQRT_2_OVER_PI = 0.7978845608028654


def _gelu(x):
    # tanh-approx GELU (documented approximation of nn.GELU()'s exact erf form)
    return 0.5 * x * (1.0 + jnp.tanh(_SQRT_2_OVER_PI * (x + 0.044715 * (x * x * x))))


def _bf16(x):
    return x.astype(jnp.bfloat16)


def _mm(a, b, dims=(((1,), (0,)), ((), ()))):
    """bf16-operand MXU matmul with f32 accumulation."""
    return jax.lax.dot_general(_bf16(a), _bf16(b), dims,
                               preferred_element_type=jnp.float32)


def _pick_tile(n, cap, align):
    """Largest divisor of n that is <= cap and a multiple of `align`;
    falls back to n (one full block) if none exists or n already fits."""
    if n <= cap:
        return n
    t = (cap // align) * align
    while t >= align:
        if n % t == 0:
            return t
        t -= align
    return n


# ----------------------------------------------------------------------------
# Pallas kernels
# ----------------------------------------------------------------------------

def _xattn_kernel(tok_ref, src_ref, pos_ref, wq_ref, wk_ref, wv_ref, wo_ref, ws_ref,
                  hs_ref, srcout_ref, *, scale):
    """Deterministic cross-attention transformer stand-in (per batch element).
    bf16 in / bf16 out.  One softmax (lane direction); the image<-token path
    reuses attn^T via a dot_general that contracts the token axis — no second
    logits matmul, no sublane-direction reductions."""
    nn_dims = (((1,), (0,)), ((), ()))
    nt_dims = (((1,), (1,)), ((), ()))

    tok = tok_ref[0]            # (T, C) bf16
    src = src_ref[0]            # (S, C) bf16
    pos = pos_ref[0]            # (S, C) bf16

    q = _mm(tok, wq_ref[...])                    # (T, C) f32
    k = _mm(src + pos, wk_ref[...])              # (S, C) f32
    v = _mm(src, wv_ref[...])                    # (S, C) f32

    logits = _mm(q, k, nt_dims) * scale          # (T, S) f32
    m = jnp.max(logits, axis=-1, keepdims=True)
    p = jnp.exp(logits - m)
    attn = p * pl.reciprocal(jnp.sum(p, axis=-1, keepdims=True), approx=True)   # (T, S)

    # token -> image path
    hs = tok.astype(jnp.float32) + _mm(_mm(attn, v), wo_ref[...])
    hs_ref[0] = hs.astype(hs_ref.dtype)

    # image <- token path: attn^T @ q without transposing or re-softmaxing
    atq = jax.lax.dot_general(_bf16(attn), _bf16(q), (((0,), (0,)), ((), ())),
                              preferred_element_type=jnp.float32)               # (S, C)
    src_out = src.astype(jnp.float32) + _mm(atq, ws_ref[...])
    srcout_ref[0] = src_out.astype(srcout_ref.dtype)


def _upscale_mask_kernel(x_ref, w1_ref, b1_ref, lnw_ref, lnb_ref, gavg_ref,
                         w2_ref, b2_ref, hyp_ref, o_ref, *, eps):
    """Fused per-row-tile pipeline (nothing leaves VMEM between stages):
       stage-1 deconv GEMM (rows, Cin)@(Cin, 4*C4)
       -> per-subpixel-group LayerNorm2d (lane-dense group-averaging matmul)
       -> GELU
       -> stage-2 deconv as ONE block-diagonal GEMM (4*C4, 16*C8) + GELU
       -> mask matmul against the replicated hypernetwork weights
          (nm*16, 16*C8) x (TM, 16*C8)^T -> (nm*16, TM) mask slab."""
    nn_dims = (((1,), (0,)), ((), ()))
    nt_dims = (((1,), (1,)), ((), ()))

    x = x_ref[0]                                                   # (TM, Cin) bf16

    # --- stage 1: ConvTranspose2d(k=2,s=2) as GEMM, columns (di1, dj1, c4) ---
    y = jax.lax.dot_general(x, w1_ref[...], nn_dims,
                            preferred_element_type=jnp.float32) + b1_ref[0]     # (TM, 4*C4)

    # --- LayerNorm2d per subpixel group: group-mean / group-var via a single
    #     (4*C4, 4*C4) averaging matrix -> fully lane-dense, no slices/concats.
    gavg = gavg_ref[...]                                           # f32, symmetric, 1/C4 blocks
    mean_b = jax.lax.dot_general(y, gavg, nn_dims, preferred_element_type=jnp.float32)
    d = y - mean_b
    var_b = jax.lax.dot_general(d * d, gavg, nn_dims, preferred_element_type=jnp.float32)
    y1 = _gelu(d * jax.lax.rsqrt(var_b + eps) * lnw_ref[0] + lnb_ref[0])        # (TM, 4*C4)

    # --- stage 2: ConvTranspose2d(k=2,s=2) as one K=4*C4 block-diag GEMM + GELU
    y2 = _gelu(jax.lax.dot_general(_bf16(y1), w2_ref[...], nn_dims,
                                   preferred_element_type=jnp.float32) + b2_ref[0])  # (TM, 16*C8)

    # --- fused mask matmul: never write the upscaled embedding to HBM ---
    o_ref[0] = jax.lax.dot_general(hyp_ref[0], _bf16(y2), nt_dims,
                                   preferred_element_type=jnp.float32).astype(o_ref.dtype)


# ----------------------------------------------------------------------------
# Wrappers
# ----------------------------------------------------------------------------

def transformer_standin(tokens, src_flat, pos_flat, p):
    """Stand-in for the injected SAM TwoWayTransformer (single cross-attn block)."""
    B, T, C = tokens.shape
    S = src_flat.shape[1]
    scale = 1.0 / math.sqrt(C)
    kern = functools.partial(_xattn_kernel, scale=scale)
    wq, wk, wv, wo, ws = (_bf16(p[k]) for k in ("wq", "wk", "wv", "wo", "ws"))
    hs, src_out = pl.pallas_call(
        kern,
        grid=(B,),
        in_specs=[
            pl.BlockSpec((1, T, C), lambda b: (b, 0, 0)),
            pl.BlockSpec((1, S, C), lambda b: (b, 0, 0)),
            pl.BlockSpec((1, S, C), lambda b: (b, 0, 0)),
            pl.BlockSpec((C, C), lambda b: (0, 0)),
            pl.BlockSpec((C, C), lambda b: (0, 0)),
            pl.BlockSpec((C, C), lambda b: (0, 0)),
            pl.BlockSpec((C, C), lambda b: (0, 0)),
            pl.BlockSpec((C, C), lambda b: (0, 0)),
        ],
        out_specs=[
            pl.BlockSpec((1, T, C), lambda b: (b, 0, 0)),
            pl.BlockSpec((1, S, C), lambda b: (b, 0, 0)),
        ],
        out_shape=(
            jax.ShapeDtypeStruct((B, T, C), jnp.bfloat16),
            jax.ShapeDtypeStruct((B, S, C), jnp.bfloat16),
        ),
        compiler_params=pltpu.CompilerParams(
            dimension_semantics=("parallel",),
            vmem_limit_bytes=_VMEM_LIMIT),
    )(_bf16(tokens), _bf16(src_flat), _bf16(pos_flat), wq, wk, wv, wo, ws)
    return hs, src_out


def heads(hs, num_mask_tokens, hp, ip):
    """Hypernetwork MLPs + IoU head in plain jnp — these GEMMs have M=batch
    rows; a dedicated kernel launch was pure overhead."""
    hs32 = hs.astype(jnp.float32)
    iou_token_out = hs32[:, 0, :]                                  # (B, C)
    mask_tokens_out = hs32[:, 1:1 + num_mask_tokens, :]            # (B, nm, C)

    h = jax.nn.relu(jnp.einsum("bnc,ncd->bnd", mask_tokens_out, hp["w1"]) + hp["b1"])
    h = jax.nn.relu(jnp.einsum("bnc,ncd->bnd", h, hp["w2"]) + hp["b2"])
    hyper_in = jnp.einsum("bnc,ncd->bnd", h, hp["w3"]) + hp["b3"]  # (B, nm, C8)

    y = jax.nn.relu(iou_token_out @ ip["w1"] + ip["b1"])
    y = jax.nn.relu(y @ ip["w2"] + ip["b2"])
    iou_pred = y @ ip["w3"] + ip["b3"]                             # (B, nm)
    return hyper_in, iou_pred


def upscale_and_masks(src2, hyper_in, up, eps=1e-6, tile_cap=2048):
    """Fused output_upscaling + mask matmul.
    src2: (B, HW, Cin) bf16 subpixel-source rows; hyper_in: (B, nm, C8) f32.
    Returns masks_rep (B, nm*16, HW) f32, column order (m, di1, dj1, di2, dj2)."""
    B, HW, Cin = src2.shape
    nm, C8 = hyper_in.shape[1], hyper_in.shape[2]
    C4 = up["w1"].shape[1]

    # stage-1 weight (Cin, C4, 2, 2) -> (Cin, 4*C4), subpixel-major columns
    w1_r = _bf16(jnp.transpose(up["w1"], (0, 2, 3, 1)).reshape(Cin, 4 * C4))
    b1_t = jnp.tile(up["b1"], 4).reshape(1, 4 * C4).astype(jnp.float32)
    lnw_t = jnp.tile(up["ln_w"], 4).reshape(1, 4 * C4).astype(jnp.float32)
    lnb_t = jnp.tile(up["ln_b"], 4).reshape(1, 4 * C4).astype(jnp.float32)

    # group-averaging matrix for LayerNorm2d over each C4-wide subpixel group
    grp = jnp.repeat(jnp.arange(4), C4)
    gavg = (grp[:, None] == grp[None, :]).astype(jnp.float32) / float(C4)       # (4*C4, 4*C4)

    # stage-2 weight as a block-diagonal (4*C4, 16*C8) so K fills the MXU
    w2_r = jnp.transpose(up["w2"], (0, 2, 3, 1)).reshape(C4, 4 * C8)
    w2_blk = _bf16((jnp.eye(4, dtype=w2_r.dtype)[:, None, :, None] *
                    w2_r[None, :, None, :]).reshape(4 * C4, 16 * C8))
    b2_t = jnp.tile(up["b2"], 16).reshape(1, 16 * C8).astype(jnp.float32)

    # per-batch hypernetwork weights replicated block-diagonally over the 16
    # subpixel groups: hyp_rep[b, m*16+g, g*C8+c] = hyper_in[b, m, c]
    eye16 = jnp.eye(16, dtype=jnp.float32)
    hyp_rep = _bf16((hyper_in[:, :, None, None, :] * eye16[None, None, :, :, None])
                    .reshape(B, nm * 16, 16 * C8))

    align = 128 if HW % 128 == 0 else 8
    tile_m = _pick_tile(HW, tile_cap, align)
    assert HW % tile_m == 0, (HW, tile_m)

    kern = functools.partial(_upscale_mask_kernel, eps=eps)
    # NOTE(v7x): weight/bias operands are grid-invariant; pipeline_mode=pl.Buffered(1)
    # could trim their double-buffer VMEM, but they total <1 MiB so it's skipped.
    masks_rep = pl.pallas_call(
        kern,
        grid=(B, HW // tile_m),
        in_specs=[
            pl.BlockSpec((1, tile_m, Cin), lambda b, t: (b, t, 0)),
            pl.BlockSpec((Cin, 4 * C4), lambda b, t: (0, 0)),
            pl.BlockSpec((1, 4 * C4), lambda b, t: (0, 0)),
            pl.BlockSpec((1, 4 * C4), lambda b, t: (0, 0)),
            pl.BlockSpec((1, 4 * C4), lambda b, t: (0, 0)),
            pl.BlockSpec((4 * C4, 4 * C4), lambda b, t: (0, 0)),
            pl.BlockSpec((4 * C4, 16 * C8), lambda b, t: (0, 0)),
            pl.BlockSpec((1, 16 * C8), lambda b, t: (0, 0)),
            pl.BlockSpec((1, nm * 16, 16 * C8), lambda b, t: (b, 0, 0)),
        ],
        out_specs=pl.BlockSpec((1, nm * 16, tile_m), lambda b, t: (b, 0, t)),
        out_shape=jax.ShapeDtypeStruct((B, nm * 16, HW), jnp.float32),
        compiler_params=pltpu.CompilerParams(
            dimension_semantics=("parallel", "parallel"),
            vmem_limit_bytes=_VMEM_LIMIT),
    )(src2, w1_r, b1_t, lnw_t, lnb_t, gavg, w2_blk, b2_t, hyp_rep)
    return masks_rep


# ----------------------------------------------------------------------------
# MaskDecoder forward
# ----------------------------------------------------------------------------

def predict_masks(params, image_embeddings, image_pe, sparse_prompt_embeddings,
                  dense_prompt_embeddings):
    nm = params["num_mask_tokens"]

    output_tokens = jnp.concatenate([params["iou_token"], params["mask_tokens"]], axis=0)
    B = sparse_prompt_embeddings.shape[0]
    output_tokens = jnp.broadcast_to(output_tokens[None], (B,) + output_tokens.shape)
    tokens = jnp.concatenate(
        [output_tokens, sparse_prompt_embeddings.astype(jnp.float32)], axis=1)   # (B, T, C)

    if image_embeddings.shape[0] != tokens.shape[0]:
        src = jnp.repeat(image_embeddings, tokens.shape[0], axis=0)
    else:
        src = image_embeddings
    src = src + dense_prompt_embeddings                                           # (B, C, H, W)
    pos_src = jnp.repeat(image_pe, tokens.shape[0], axis=0)

    b, c, h, w = src.shape
    src_flat = jnp.transpose(src.reshape(b, c, h * w), (0, 2, 1))                 # (B, HW, C)
    pos_flat = jnp.transpose(pos_src.reshape(b, c, h * w), (0, 2, 1))

    hs, src2 = transformer_standin(tokens, src_flat, pos_flat, params["tf"])      # bf16, bf16

    hyper_in, iou_pred = heads(hs, nm, params["hyper"], params["iou"])            # (B,nm,C8), (B,nm)

    # Fused: deconv1 + LN + GELU + deconv2 + GELU + mask matmul (one kernel).
    masks_rep = upscale_and_masks(src2, hyper_in, params["up"])                   # (B, nm*16, HW)

    # Final spatial reorder on the small masks tensor only:
    # masks_rep[b, m*16 + (di1*2+dj1)*4 + (di2*2+dj2), i*w+j]
    #   -> masks[b, m, 4i+2*di1+di2, 4j+2*dj1+dj2]
    masks = masks_rep.reshape(b, nm, 2, 2, 2, 2, h, w)
    masks = jnp.transpose(masks, (0, 1, 6, 2, 4, 7, 3, 5)).reshape(b, nm, 4 * h, 4 * w)
    return masks, iou_pred


def mask_decoder_forward(params, image_embeddings, image_pe, sparse_prompt_embeddings,
                         dense_prompt_embeddings, multimask_output):
    masks, iou_pred = predict_masks(params, image_embeddings, image_pe,
                                    sparse_prompt_embeddings, dense_prompt_embeddings)
    if multimask_output:
        masks = masks[:, 1:, :, :]
        iou_pred = iou_pred[:, 1:]
    else:
        masks = masks[:, 0:1, :, :]
        iou_pred = iou_pred[:, 0:1]
    return masks, iou_pred


# ----------------------------------------------------------------------------
# Deterministic parameter initialization
# ----------------------------------------------------------------------------

def init_params(key, transformer_dim=32, num_multimask_outputs=3, iou_head_hidden_dim=32):
    C = transformer_dim
    C4, C8 = C // 4, C // 8
    nm = num_multimask_outputs + 1
    ks = iter(jax.random.split(key, 40))
    n = lambda shape, s=0.05: (s * jax.random.normal(next(ks), shape)).astype(jnp.float32)

    params = {
        "transformer_dim": C,
        "num_mask_tokens": nm,
        "iou_token": n((1, C)),
        "mask_tokens": n((nm, C)),
        "tf": {
            "wq": n((C, C), 1.0 / math.sqrt(C)),
            "wk": n((C, C), 1.0 / math.sqrt(C)),
            "wv": n((C, C), 1.0 / math.sqrt(C)),
            "wo": n((C, C), 1.0 / math.sqrt(C)),
            "ws": n((C, C), 1.0 / math.sqrt(C)),
        },
        "up": {
            "w1": n((C, C4, 2, 2)),        # ConvTranspose2d weight (Cin, Cout, kH, kW)
            "b1": n((C4,)),
            "ln_w": 1.0 + n((C4,), 0.1),   # LayerNorm2d
            "ln_b": n((C4,), 0.1),
            "w2": n((C4, C8, 2, 2)),
            "b2": n((C8,)),
        },
        "hyper": {                          # stacked per-mask-token 3-layer MLPs
            "w1": n((nm, C, C)), "b1": n((nm, C)),
            "w2": n((nm, C, C)), "b2": n((nm, C)),
            "w3": n((nm, C, C8)), "b3": n((nm, C8)),
        },
        "iou": {                            # iou_prediction_head MLP (depth 3)
            "w1": n((C, iou_head_hidden_dim)), "b1": n((iou_head_hidden_dim,)),
            "w2": n((iou_head_hidden_dim, iou_head_hidden_dim)), "b2": n((iou_head_hidden_dim,)),
            "w3": n((iou_head_hidden_dim, nm)), "b3": n((nm,)),
        },
    }
    return params


# ----------------------------------------------------------------------------

if __name__ == "__main__":
    key = jax.random.PRNGKey(0)
    k_param, k1, k2, k3, k4 = jax.random.split(key, 5)

    transformer_dim = 32
    H = W = 8
    B = 2                   # batch of prompt sets
    num_prompts = 4

    params = init_params(k_param, transformer_dim=transformer_dim,
                         num_multimask_outputs=3, iou_head_hidden_dim=32)

    image_embeddings = jax.random.normal(k1, (1, transformer_dim, H, W), dtype=jnp.float32)
    image_pe = jax.random.normal(k2, (1, transformer_dim, H, W), dtype=jnp.float32)
    sparse_prompt_embeddings = jax.random.normal(k3, (B, num_prompts, transformer_dim),
                                                 dtype=jnp.float32)
    dense_prompt_embeddings = jax.random.normal(k4, (B, transformer_dim, H, W),
                                                dtype=jnp.float32)

    masks, iou_pred = mask_decoder_forward(
        params, image_embeddings, image_pe,
        sparse_prompt_embeddings, dense_prompt_embeddings,
        multimask_output=True)

    masks = jax.block_until_ready(masks)
    iou_pred = jax.block_until_ready(iou_pred)

    assert masks.shape == (B, 3, 4 * H, 4 * W), masks.shape
    assert iou_pred.shape == (B, 3), iou_pred.shape
    assert jnp.all(jnp.isfinite(masks)) and jnp.all(jnp.isfinite(iou_pred))

    print("KERNEL_OK")
</pallas_src>

<mosaic_0001>
module attributes {stable_mosaic.version = 11 : i64} {
  func.func @_xattn_kernel(%arg0: i32, %arg1: memref<1x9x32xbf16, #tpu.memory_space<vmem>>, %arg2: memref<1x64x32xbf16, #tpu.memory_space<vmem>>, %arg3: memref<1x64x32xbf16, #tpu.memory_space<vmem>>, %arg4: memref<32x32xbf16, #tpu.memory_space<vmem>>, %arg5: memref<32x32xbf16, #tpu.memory_space<vmem>>, %arg6: memref<32x32xbf16, #tpu.memory_space<vmem>>, %arg7: memref<32x32xbf16, #tpu.memory_space<vmem>>, %arg8: memref<32x32xbf16, #tpu.memory_space<vmem>>, %arg9: memref<1x9x32xbf16, #tpu.memory_space<vmem>>, %arg10: memref<1x64x32xbf16, #tpu.memory_space<vmem>>) attributes {dimension_semantics = [#tpu.dimension_semantics<parallel>], iteration_bounds = array<i64: 2>, scalar_prefetch = 0 : i64, scratch_operands = 0 : i64, tpu.core_type = #tpu.core_type<tc>, window_params = [{transform_indices = @transform_0, window_bounds = array<i64: 1, 9, 32>}, {transform_indices = @transform_1, window_bounds = array<i64: 1, 64, 32>}, {transform_indices = @transform_2, window_bounds = array<i64: 1, 64, 32>}, {pipeline_mode = #tpu.pipeline_mode<synchronous>, transform_indices = @transform_3, window_bounds = array<i64: 32, 32>}, {pipeline_mode = #tpu.pipeline_mode<synchronous>, transform_indices = @transform_4, window_bounds = array<i64: 32, 32>}, {pipeline_mode = #tpu.pipeline_mode<synchronous>, transform_indices = @transform_5, window_bounds = array<i64: 32, 32>}, {pipeline_mode = #tpu.pipeline_mode<synchronous>, transform_indices = @transform_6, window_bounds = array<i64: 32, 32>}, {pipeline_mode = #tpu.pipeline_mode<synchronous>, transform_indices = @transform_7, window_bounds = array<i64: 32, 32>}, {transform_indices = @transform_8, window_bounds = array<i64: 1, 9, 32>}, {transform_indices = @transform_9, window_bounds = array<i64: 1, 64, 32>}]} {
    %c0 = arith.constant 0 : index
    %c0_0 = arith.constant 0 : index
    %c0_1 = arith.constant 0 : index
    %0 = vector.load %arg1[%c0, %c0_0, %c0_1] : memref<1x9x32xbf16, #tpu.memory_space<vmem>>, vector<1x9x32xbf16>
    %1 = vector.shape_cast %0 : vector<1x9x32xbf16> to vector<9x32xbf16>
    %c0_2 = arith.constant 0 : index
    %c0_3 = arith.constant 0 : index
    %c0_4 = arith.constant 0 : index
    %2 = vector.load %arg2[%c0_2, %c0_3, %c0_4] : memref<1x64x32xbf16, #tpu.memory_space<vmem>>, vector<1x64x32xbf16>
    %3 = vector.shape_cast %2 : vector<1x64x32xbf16> to vector<64x32xbf16>
    %c0_5 = arith.constant 0 : index
    %c0_6 = arith.constant 0 : index
    %c0_7 = arith.constant 0 : index
    %4 = vector.load %arg3[%c0_5, %c0_6, %c0_7] : memref<1x64x32xbf16, #tpu.memory_space<vmem>>, vector<1x64x32xbf16>
    %5 = vector.shape_cast %4 : vector<1x64x32xbf16> to vector<64x32xbf16>
    %c0_8 = arith.constant 0 : index
    %c0_9 = arith.constant 0 : index
    %6 = vector.load %arg4[%c0_8, %c0_9] : memref<32x32xbf16, #tpu.memory_space<vmem>>, vector<32x32xbf16>
    %cst = arith.constant dense<0.000000e+00> : vector<9x32xf32>
    %7 = tpu.matmul %1, %6, %cst {dimension_numbers = #tpu.dot_dimension_numbers<[1], [0], [0], [1], [0, 0, 1, 1], [], []>} : vector<9x32xbf16>, vector<32x32xbf16>, vector<9x32xf32> -> vector<9x32xf32>
    %8 = arith.addf %3, %5 : vector<64x32xbf16>
    %c0_10 = arith.constant 0 : index
    %c0_11 = arith.constant 0 : index
    %9 = vector.load %arg5[%c0_10, %c0_11] : memref<32x32xbf16, #tpu.memory_space<vmem>>, vector<32x32xbf16>
    %cst_12 = arith.constant dense<0.000000e+00> : vector<64x32xf32>
    %10 = tpu.matmul %8, %9, %cst_12 {dimension_numbers = #tpu.dot_dimension_numbers<[1], [0], [0], [1], [0, 0, 1, 1], [], []>} : vector<64x32xbf16>, vector<32x32xbf16>, vector<64x32xf32> -> vector<64x32xf32>
    %c0_13 = arith.constant 0 : index
    %c0_14 = arith.constant 0 : index
    %11 = vector.load %arg6[%c0_13, %c0_14] : memref<32x32xbf16, #tpu.memory_space<vmem>>, vector<32x32xbf16>
    %cst_15 = arith.constant dense<0.000000e+00> : vector<64x32xf32>
    %12 = tpu.matmul %3, %11, %cst_15 {dimension_numbers = #tpu.dot_dimension_numbers<[1], [0], [0], [1], [0, 0, 1, 1], [], []>} : vector<64x32xbf16>, vector<32x32xbf16>, vector<64x32xf32> -> vector<64x32xf32>
    %13 = arith.truncf %7 : vector<9x32xf32> to vector<9x32xbf16>
    %14 = arith.truncf %10 : vector<64x32xf32> to vector<64x32xbf16>
    %cst_16 = arith.constant dense<0.000000e+00> : vector<9x64xf32>
    %15 = tpu.matmul %13, %14, %cst_16 {dimension_numbers = #tpu.dot_dimension_numbers<[1], [1], [0], [0], [0, 0, 1, 0], [], []>} : vector<9x32xbf16>, vector<64x32xbf16>, vector<9x64xf32> -> vector<9x64xf32>
    %cst_17 = arith.constant 0.176776692 : f32
    %16 = vector.broadcast %cst_17 : f32 to vector<9x64xf32>
    %17 = arith.mulf %15, %16 : vector<9x64xf32>
    %cst_18 = arith.constant dense<0xFF800000> : vector<9xf32>
    %18 = vector.multi_reduction <maximumf>, %17, %cst_18 [1] : vector<9x64xf32> to vector<9xf32>
    %19 = vector.shape_cast %18 : vector<9xf32> to vector<9x1xf32>
    %20 = vector.broadcast %19 : vector<9x1xf32> to vector<9x64xf32>
    %21 = arith.subf %17, %20 : vector<9x64xf32>
    %22 = math.exp %21 : vector<9x64xf32>
    %cst_19 = arith.constant dense<0.000000e+00> : vector<9xf32>
    %23 = vector.multi_reduction <add>, %22, %cst_19 [1] : vector<9x64xf32> to vector<9xf32>
    %24 = vector.shape_cast %23 : vector<9xf32> to vector<9x1xf32>
    %25 = tpu.reciprocal %24 {approx = true} : vector<9x1xf32> -> vector<9x1xf32>
    %26 = vector.broadcast %25 : vector<9x1xf32> to vector<9x64xf32>
    %27 = arith.mulf %22, %26 : vector<9x64xf32>
    %28 = arith.extf %1 : vector<9x32xbf16> to vector<9x32xf32>
    %29 = arith.truncf %27 : vector<9x64xf32> to vector<9x64xbf16>
    %30 = arith.truncf %12 : vector<64x32xf32> to vector<64x32xbf16>
    %cst_20 = arith.constant dense<0.000000e+00> : vector<9x32xf32>
    %31 = tpu.matmul %29, %30, %cst_20 {dimension_numbers = #tpu.dot_dimension_numbers<[1], [0], [0], [1], [0, 0, 1, 1], [], []>} : vector<9x64xbf16>, vector<64x32xbf16>, vector<9x32xf32> -> vector<9x32xf32>
    %c0_21 = arith.constant 0 : index
    %c0_22 = arith.constant 0 : index
    %32 = vector.load %arg7[%c0_21, %c0_22] : memref<32x32xbf16, #tpu.memory_space<vmem>>, vector<32x32xbf16>
    %33 = arith.truncf %31 : vector<9x32xf32> to vector<9x32xbf16>
    %cst_23 = arith.constant dense<0.000000e+00> : vector<9x32xf32>
    %34 = tpu.matmul %33, %32, %cst_23 {dimension_numbers = #tpu.dot_dimension_numbers<[1], [0], [0], [1], [0, 0, 1, 1], [], []>} : vector<9x32xbf16>, vector<32x32xbf16>, vector<9x32xf32> -> vector<9x32xf32>
    %35 = arith.addf %28, %34 : vector<9x32xf32>
    %36 = arith.truncf %35 : vector<9x32xf32> to vector<9x32xbf16>
    %c0_24 = arith.constant 0 : index
    %c0_25 = arith.constant 0 : index
    %c0_26 = arith.constant 0 : index
    %37 = vector.load %arg9[%c0_24, %c0_25, %c0_26] : memref<1x9x32xbf16, #tpu.memory_space<vmem>>, vector<1x9x32xbf16>
    %38 = vector.shape_cast %37 : vector<1x9x32xbf16> to vector<9x32xbf16>
    %39 = vector.shape_cast %36 : vector<9x32xbf16> to vector<1x9x32xbf16>
    tpu.vector_store %arg9[%c0_24, %c0_25, %c0_26], %39 {strides = array<i32>} : memref<1x9x32xbf16, #tpu.memory_space<vmem>>, vector<1x9x32xbf16>,
    %40 = arith.truncf %27 : vector<9x64xf32> to vector<9x64xbf16>
    %41 = arith.truncf %7 : vector<9x32xf32> to vector<9x32xbf16>
    %cst_27 = arith.constant dense<0.000000e+00> : vector<64x32xf32>
    %42 = tpu.matmul %40, %41, %cst_27 {dimension_numbers = #tpu.dot_dimension_numbers<[0], [0], [1], [1], [0, 1, 1, 1], [], []>} : vector<9x64xbf16>, vector<9x32xbf16>, vector<64x32xf32> -> vector<64x32xf32>
    %43 = arith.extf %3 : vector<64x32xbf16> to vector<64x32xf32>
    %c0_28 = arith.constant 0 : index
    %c0_29 = arith.constant 0 : index
    %44 = vector.load %arg8[%c0_28, %c0_29] : memref<32x32xbf16, #tpu.memory_space<vmem>>, vector<32x32xbf16>
    %45 = arith.truncf %42 : vector<64x32xf32> to vector<64x32xbf16>
    %cst_30 = arith.constant dense<0.000000e+00> : vector<64x32xf32>
    %46 = tpu.matmul %45, %44, %cst_30 {dimension_numbers = #tpu.dot_dimension_numbers<[1], [0], [0], [1], [0, 0, 1, 1], [], []>} : vector<64x32xbf16>, vector<32x32xbf16>, vector<64x32xf32> -> vector<64x32xf32>
    %47 = arith.addf %43, %46 : vector<64x32xf32>
    %48 = arith.truncf %47 : vector<64x32xf32> to vector<64x32xbf16>
    %c0_31 = arith.constant 0 : index
    %c0_32 = arith.constant 0 : index
    %c0_33 = arith.constant 0 : index
    %49 = vector.load %arg10[%c0_31, %c0_32, %c0_33] : memref<1x64x32xbf16, #tpu.memory_space<vmem>>, vector<1x64x32xbf16>
    %50 = vector.shape_cast %49 : vector<1x64x32xbf16> to vector<64x32xbf16>
    %51 = vector.shape_cast %48 : vector<64x32xbf16> to vector<1x64x32xbf16>
    tpu.vector_store %arg10[%c0_31, %c0_32, %c0_33], %51 {strides = array<i32>} : memref<1x64x32xbf16, #tpu.memory_space<vmem>>, vector<1x64x32xbf16>,
    return
  }
  func.func @transform_0(%arg0: i32) -> (i32, i32, i32) {
    %c0_i32 = arith.constant 0 : i32
    %c0_i32_0 = arith.constant 0 : i32
    %c0_i32_1 = arith.constant 0 : i32
    return %arg0, %c0_i32, %c0_i32_0 : i32, i32, i32
  }
  func.func @transform_1(%arg0: i32) -> (i32, i32, i32) {
    %c0_i32 = arith.constant 0 : i32
    %c0_i32_0 = arith.constant 0 : i32
    %c0_i32_1 = arith.constant 0 : i32
    return %arg0, %c0_i32, %c0_i32_0 : i32, i32, i32
  }
  func.func @transform_2(%arg0: i32) -> (i32, i32, i32) {
    %c0_i32 = arith.constant 0 : i32
    %c0_i32_0 = arith.constant 0 : i32
    %c0_i32_1 = arith.constant 0 : i32
    return %arg0, %c0_i32, %c0_i32_0 : i32, i32, i32
  }
  func.func @transform_3(%arg0: i32) -> (i32, i32) {
    %c0_i32 = arith.constant 0 : i32
    %c0_i32_0 = arith.constant 0 : i32
    %c0_i32_1 = arith.constant 0 : i32
    return %c0_i32, %c0_i32_0 : i32, i32
  }
  func.func @transform_4(%arg0: i32) -> (i32, i32) {
    %c0_i32 = arith.constant 0 : i32
    %c0_i32_0 = arith.constant 0 : i32
    %c0_i32_1 = arith.constant 0 : i32
    return %c0_i32, %c0_i32_0 : i32, i32
  }
  func.func @transform_5(%arg0: i32) -> (i32, i32) {
    %c0_i32 = arith.constant 0 : i32
    %c0_i32_0 = arith.constant 0 : i32
    %c0_i32_1 = arith.constant 0 : i32
    return %c0_i32, %c0_i32_0 : i32, i32
  }
  func.func @transform_6(%arg0: i32) -> (i32, i32) {
    %c0_i32 = arith.constant 0 : i32
    %c0_i32_0 = arith.constant 0 : i32
    %c0_i32_1 = arith.constant 0 : i32
    return %c0_i32, %c0_i32_0 : i32, i32
  }
  func.func @transform_7(%arg0: i32) -> (i32, i32) {
    %c0_i32 = arith.constant 0 : i32
    %c0_i32_0 = arith.constant 0 : i32
    %c0_i32_1 = arith.constant 0 : i32
    return %c0_i32, %c0_i32_0 : i32, i32
  }
  func.func @transform_8(%arg0: i32) -> (i32, i32, i32) {
    %c0_i32 = arith.constant 0 : i32
    %c0_i32_0 = arith.constant 0 : i32
    %c0_i32_1 = arith.constant 0 : i32
    return %arg0, %c0_i32, %c0_i32_0 : i32, i32, i32
  }
  func.func @transform_9(%arg0: i32) -> (i32, i32, i32) {
    %c0_i32 = arith.constant 0 : i32
    %c0_i32_0 = arith.constant 0 : i32
    %c0_i32_1 = arith.constant 0 : i32
    return %arg0, %c0_i32, %c0_i32_0 : i32, i32, i32
  }
}

</mosaic_0001>

<bundles_post_ra>
// kernel: tpu_custom_call.1
= control target key start
LH: loop header
LB: loop body
LE: loop exit
PB: predicated region body
PF: predicated region fallthrough
CT: control target
= control target key end

     0   :  { %s1589_s30 = smov 0   ;;  %s1773_s0 = inlined_call_operand.vmem [shape: bf16[2,9,32], index: 0, kind: input, shape index: {}]   ;;  %s1774_s1 = inlined_call_operand.vmem [shape: bf16[2,64,32], index: 1, kind: input, shape index: {}]   ;;  %s1775_s2 = inlined_call_operand.vmem [shape: bf16[2,64,32], index: 2, kind: input, shape index: {}]   ;;  %s1776_s3 = inlined_call_operand.vmem [shape: bf16[32,32], index: 3, kind: input, shape index: {}]   ;;  %s1777_s4 = inlined_call_operand.vmem [shape: bf16[32,32], index: 4, kind: input, shape index: {}]   ;;  %s1778_s5 = inlined_call_operand.vmem [shape: bf16[32,32], index: 5, kind: input, shape index: {}]   ;;  %s1779_s6 = inlined_call_operand.vmem [shape: bf16[32,32], index: 6, kind: input, shape index: {}]   ;;  %s1780_s7 = inlined_call_operand.vmem [shape: bf16[32,32], index: 7, kind: input, shape index: {}]   ;;  %s1781_s8 = inlined_call_operand.vmem [shape: bf16[2,9,32], index: 8, kind: output, shape index: {0}]   ;;  %s1782_s9 = inlined_call_operand.vmem [shape: bf16[2,64,32], index: 9, kind: output, shape index: {1}]  }
   0x1 LB: > { %s1287_s10 = sadd.s32 4294967295, %s1534_s30   ;;  %p1291_p0 = scmp.ge.s32.totalorder %s1534_s30, 1  ;;  %s1534_s30 = sphi %s1589_s30, %s20_s30  }
   0x2   : > { %p310_p1 = scmp.lt.s32.totalorder %s1534_s30, 3 }
   0x4   : > { %p311_p2 = pnand %p1291_p0, %p310_p1 }
   0x5   : > { %v1505_v0 = vld [vmem:[%s1777_s4] sm:$0xff] (!%p311_p2)   ;;  %p361_p3 = scmp.lt.s32.totalorder (!%p311_p2), %s1287_s10, 1  ;;  %v1506_v1 = vld [vmem:[%s1777_s4 + $0x8] sm:$0xff] (!%p311_p2)   ;;  %vm426_vm0 = vcmask (!%p311_p2), 261120   ;;  %v1536_v2 = vmov (!%p311_p2), 0.0   ;;  %vm1537_vm1 = vmmov (!%p311_p2), 0  }
   0x6   : > { %314 = sbr.rel (%p311_p2) target bundleno = 1476 (0x5c4), region = 52  ;;  %1415 = vmatprep.subr.bf16.mxu1 (!%p311_p2), %v1505_v0  ;;  %1407 = vmatprep.subr.bf16.mxu0 (!%p311_p2), %v1536_v2  ;;  %v1507_v3 = vld [vmem:[%s1776_s3] sm:$0xff] (!%p311_p2)   ;;  %v1508_v4 = vld [vmem:[%s1776_s3 + $0x8] sm:$0xff] (!%p311_p2)   ;;  %vm768_vm2 = vcmask (!%p311_p2), 523264   ;;  %vm772_vm3 = vcmask (!%p311_p2), 516096   ;;  %vm951_vm4 = vcmask (!%p311_p2), 1043456  }
   0x7   : > { %1416 = vmatpush3.bf16.msra.mxu1 (!%p311_p2), %v1505_v0  ;;  %1411 = vmatprep.mubr.msk.bf16.mxu0 (!%p311_p2), %vm1537_vm1, %v1536_v2  ;;  %v1510_v57 = vld [vmem:[%s1778_s5] sm:$0xff] (!%p311_p2)   ;;  %v1511_v58 = vld [vmem:[%s1778_s5 + $0x8] sm:$0xff] (!%p311_p2)   ;;  %vm952_vm5 = vcmask (!%p311_p2), 1044480   ;;  %vm938_vm6 = vcmask (!%p311_p2), 72704   ;;  %vm916_vm7 = vcmask (!%p311_p2), 253952   ;;  %vm914_vm9 = vcmask (!%p311_p2), 257024  }
   0x8   : > { %1417 = vmatprep.subr.bf16.mxu1 (!%p311_p2), %v1506_v1  ;;  %1408 = vmatpush3.bf16.msra.mxu0 (!%p311_p2), %v1507_v3  ;;  %vm917_vm8 = vsmask.f32 (!%p311_p2), 256 }
   0x9   : > { %1409 = vmatprep.subr.bf16.mxu0 (!%p311_p2), %v1536_v2  ;;  %vm918_vm10 = vmand (!%p311_p2), %vm916_vm7, %vm917_vm8 }
   0xb   : > { %1418 = vmatpush3.bf16.msra.mxu1 (!%p311_p2), %v1506_v1 }
   0xc   : > { %1439 = vmatprep.subr.bf16.mxu1 (!%p311_p2), %v1536_v2  ;;  %1410 = vmatpush3.bf16.msra.mxu0 (!%p311_p2), %v1508_v4 }
   0xd   : > { %s1784_s10 = smov (!%p361_p3, %s1287_s10), 1  ;;  %1427 = vmatprep.subr.bf16.mxu0 %v1510_v57 }
   0xe   : > { %s1610_s17 = sshll.u32 %s1784_s10, 5  ;;  %s1353_s20 = sshll.u32 %s1784_s10, 3 }
   0xf   : > { %s370_s23 = scalar_lea.vmem %s1774_s1, %s1610_s17  ;;  %s375_s26 = scalar_lea.vmem %s1775_s2, %s1610_s17 }
  0x10   : > { %v1626_v5 = vld [vmem:[%s370_s23] sm:$0xf]  ;;  %v1628_v6 = vld [vmem:[%s370_s23 + $0x4] sm:$0xf]  ;;  %v1632_v10 = vld [vmem:[%s370_s23 + $0x8] sm:$0xf]  ;;  %s365_s29 = scalar_lea.vmem %s1773_s0, %s1353_s20  ;;  %s380_s27 = scalar_lea.vmem %s1781_s8, %s1353_s20 }
  0x11   : > { %v397_v7 = vld [vmem:[%s375_s26] sm:$0xf]  ;;  %v398_v8 = vld [vmem:[%s375_s26 + $0x4] sm:$0xf]  ;;  %v1634_v11 = vld [vmem:[%s370_s23 + $0xc] sm:$0xf]  ;;  %v1316_v59 = vcombine.low %v1626_v5, %v1628_v6  ;;  %s1748_s28 = scalar_lea.vmem %s1782_s9, %s1610_s17 }
  0x12   : > { %v471_v9 = vadd.bf16 %v397_v7, %v1626_v5  ;;  %v472_v12 = vadd.bf16 %v398_v8, %v1628_v6  ;;  %v399_v13 = vld [vmem:[%s375_s26 + $0x8] sm:$0xf]  ;;  %v400_v14 = vld [vmem:[%s375_s26 + $0xc] sm:$0xf]  ;;  %v1637_v15 = vld [vmem:[%s370_s23 + $0x10] sm:$0xf]  ;;  %v1317_v60 = vcombine.low %v1632_v10, %v1634_v11 }
  0x13   : > { %v473_v16 = vadd.bf16 %v399_v13, %v1632_v10  ;;  %v474_v17 = vadd.bf16 %v400_v14, %v1634_v11  ;;  %v1647_v18 = vld [vmem:[%s370_s23 + $0x14] sm:$0xf]  ;;  %v401_v19 = vld [vmem:[%s375_s26 + $0x10] sm:$0xf]  ;;  %v1651_v24 = vld [vmem:[%s370_s23 + $0x18] sm:$0xf] }
  0x14   : > { %v402_v20 = vld [vmem:[%s375_s26 + $0x14] sm:$0xf]  ;;  %v1306_v21 = vcombine.low %v471_v9, %v472_v12  ;;  %v475_v22 = vadd.bf16 %v401_v19, %v1637_v15  ;;  %v1653_v25 = vld [vmem:[%s370_s23 + $0x1c] sm:$0xf]  ;;  %v403_v26 = vld [vmem:[%s375_s26 + $0x18] sm:$0xf]  ;;  %v1318_v61 = vcombine.low %v1637_v15, %v1647_v18 }
  0x15   : > { %v476_v23 = vadd.bf16 %v402_v20, %v1647_v18  ;;  %v1307_v27 = vcombine.low %v473_v16, %v474_v17  ;;  %v404_v28 = vld [vmem:[%s375_s26 + $0x1c] sm:$0xf]  ;;  %v1655_v29 = vld [vmem:[%s365_s29] sm:$0xf]  ;;  %v1657_v30 = vld [vmem:[%s365_s29 + $0x4] sm:$0x1]  ;;  %v477_v33 = vadd.bf16 %v403_v26, %v1651_v24  ;;  %v1319_v62 = vcombine.low %v1651_v24, %v1653_v25 }
  0x16   : > { %1419 = vmatprep.mubr.msk.bf16.mxu1 %vm426_vm0, %v1306_v21  ;;  %v1302_v32 = vcombine.low %v1655_v29, %v1657_v30  ;;  %v478_v34 = vadd.bf16 %v404_v28, %v1653_v25 }
  0x17   : > { %v1308_v31 = vcombine.low %v475_v22, %v476_v23  ;;  %1420 = vmatmul.mubr.msk.bf16.vlgmr.msra.gmra.mrb[0].mxu1 %vm426_vm0, %v1307_v27 }
  0x18   : > { %1412 = vmatmul.mubr.msk.bf16.vlgmr.msra.gmra.mrb[0].mxu0 %vm426_vm0, %v1302_v32  ;;  %v1309_v35 = vcombine.low %v477_v33, %v478_v34 }
  0x19   : > { %1423 = vmatprep.mubr.msk.bf16.mxu1 %vm426_vm0, %v1308_v31  ;;  %1431 = vmatprep.mubr.msk.bf16.mxu0 %vm426_vm0, %v1316_v59 }
  0x1a   : > { %1428 = vmatpush3.bf16.msra.mxu0 %v1510_v57 }
  0x1b   : > { %1429 = vmatprep.subr.bf16.mxu0 %v1511_v58 }
  0x1e   : > { %1430 = vmatpush3.bf16.msra.mxu0 %v1511_v58 }
  0x1f   : > { %1424 = vmatmul.mubr.msk.bf16.gmra.mrb[4].mxu1 %vm426_vm0, %v1309_v35  ;;  %1451 = vmatprep.subr.bf16.mxu0 %v1536_v2 }
  0x20   : > { %1447 = vmatprep.mubr.msk.bf16.mxu1 %vm1537_vm1, %v1536_v2 }
  0x21   : > { %1432 = vmatmul.mubr.msk.bf16.vlgmr.msra.gmra.mrb[4].mxu0 %vm426_vm0, %v1317_v60 }
  0x22   : > { %1435 = vmatprep.mubr.msk.bf16.mxu0 %vm426_vm0, %v1318_v61 }
  0x29   : > { %1436 = vmatmul.mubr.msk.bf16.gmra.mrb[8].mxu0 %vm426_vm0, %v1319_v62  ;;  %v1519_v62 = vld [vmem:[%s1780_s7 + $0x8] sm:$0xff]  }
  0x2a   : > { %1459 = vmatprep.mubr.msk.bf16.mxu0 %vm1537_vm1, %v1536_v2 }
  0xea   : > { %v1421_v36 = vpop.f32.mrb[0].mxu1 }
  0xeb   : > { %v561_v37 = vpop.f32.mrb[1].mxu1  ;;  %v464_v38 = vpop.f32.mrb[0].mxu0 }
  0xec   : > { %v1422_v39 = vpop.f32.mrb[2].mxu1  ;;  %v1413_v40 = vpop.f32.mrb[1].mxu0 }
  0xed   : > { %v707_v41 = vpack.c.bf16 %v1422_v39, %v1421_v36  ;;  %v564_v42 = vpop.f32.mrb[3].mxu1  ;;  %v467_v43 = vpop.f32.mrb[2].mxu0 }
  0xee   : > { %v706_v44 = vpack.c.bf16 %v564_v42, %v561_v37  ;;  %v1670_v45 = vpack.c.bf16 %v467_v43, %v464_v38  ;;  %v1414_v46 = vpop.f32.mrb[3].mxu0 }
  0xef   : > { %v717_v54 = vsel %vm426_vm0, %v707_v41, 0 }
  0xf0   : > { %v714_v47 = vsel %vm426_vm0, %v706_v44, 0 }
  0xf1   : > { %1440 = vmatpush3.bf16.xpose.msra.mxu1 %v714_v47  ;;  %v1516_v47 = vld [vmem:[%s1779_s6] sm:$0xff]  }
  0xf2   : > { %v1425_v48 = vpop.f32.mrb[4].mxu1  ;;  %1441 = vmatprep.subr.bf16.mxu1 %v1536_v2 }
  0xf3   : > { %v577_v49 = vpop.f32.mrb[5].mxu1 }
  0xf4   : > { %v1426_v50 = vpop.f32.mrb[6].mxu1  ;;  %v1433_v12 = vpop.f32.mrb[4].mxu0 }
  0xf5   : > { %v709_v51 = vpack.c.bf16 %v1426_v50, %v1425_v48  ;;  %v580_v52 = vpop.f32.mrb[7].mxu1  ;;  %v674_v13 = vpop.f32.mrb[5].mxu0  ;;  %v1538_v48 = vmov 65535  }
  0xf6   : > { %v708_v53 = vpack.c.bf16 %v580_v52, %v577_v49  ;;  %v1434_v14 = vpop.f32.mrb[6].mxu0  ;;  %v953_v49 = vsel %vm951_vm4, 4294967295, %v1538_v48  ;;  %v1517_v52 = vld [vmem:[%s1779_s6 + $0x8] sm:$0xff]  }
  0xf7   : > { %v723_v56 = vsel %vm426_vm0, %v709_v51, 0  ;;  %v796_v16 = vpack.c.bf16 %v1434_v14, %v1433_v12  ;;  %v677_v17 = vpop.f32.mrb[7].mxu0  ;;  %v954_v51 = vsel %vm952_vm5, %v953_v49, 0  ;;  %v1027_v49 = vunpack.c.l.bf16 %v1647_v18 }
  0xf8   : > { %v720_v55 = vsel %vm426_vm0, %v708_v53, 0  ;;  %v795_v19 = vpack.c.bf16 %v677_v17, %v674_v13  ;;  %v955_v53 = vand.u32 %v954_v51, %v1670_v45  ;;  %v919_v13 = vld [vmem:[%s380_s27 + $0x4] sm:$0x1] }
  0xf9   : > { %1442 = vmatpush3.bf16.xpose.msra.mxu1 %v717_v54 }
  0xfa   : > { %1443 = vmatprep.subr.bf16.mxu1 %v1536_v2  ;;  %1452 = vmatpush3.bf16.msra.mxu0 %v795_v19 }
  0xfb   : > { %1453 = vmatprep.subr.bf16.mxu0 %v1536_v2 }
  0xfc   : > { %v1437_v20 = vpop.f32.mrb[8].mxu0 }
  0xfd   : > { %v690_v35 = vpop.f32.mrb[9].mxu0 }
  0xfe   : > { %1454 = vmatpush3.bf16.msra.mxu0 %v796_v16  ;;  %v1438_v36 = vpop.f32.mrb[10].mxu0 }
  0xff   : > { %1455 = vmatprep.subr.bf16.mxu0 %v1536_v2  ;;  %v798_v37 = vpack.c.bf16 %v1438_v36, %v1437_v20  ;;  %v693_v38 = vpop.f32.mrb[11].mxu0  ;;  %v1023_v36 = vunpack.c.l.bf16 %v1628_v6 }
 0x100   : > { %v797_v39 = vpack.c.bf16 %v693_v38, %v690_v35 }
 0x101   : > { %1444 = vmatpush3.bf16.xpose.msra.mxu1 %v720_v55 }
 0x102   : > { %1445 = vmatprep.subr.bf16.mxu1 %v1536_v2  ;;  %1456 = vmatpush3.bf16.msra.mxu0 %v797_v39 }
 0x103   : > { %1457 = vmatprep.subr.bf16.mxu0 %v1536_v2 }
 0x106   : > { %1458 = vmatpush3.bf16.msra.mxu0 %v798_v37 }
 0x107   : > { %1463 = vmatprep.subr.bf16.mxu0 %v1536_v2 }
 0x109   : > { %1446 = vmatpush3.bf16.xpose.msra.mxu1 %v723_v56 }
 0x110   : > { %1448 = vmatmul.mubr.msk.bf16.vlgmr.msra.gmra.mrb[8].mxu1 %vm426_vm0, %v1670_v45  ;;  %v1518_v45 = vld [vmem:[%s1780_s7] sm:$0xff]  }
 0x111   : > { %1481 = vmatprep.subr.bf16.mxu1 %v1518_v45 }
 0x112   : > { %1482 = vmatpush3.bf16.msra.mxu1 %v1518_v45 }
 0x113   : > { %1483 = vmatprep.subr.bf16.mxu1 %v1519_v62 }
 0x116   : > { %1484 = vmatpush3.bf16.msra.mxu1 %v1519_v62 }
 0x1e3   : > { %v759_v63 = vpop.f32.mrb[8].mxu1 }
 0x1e4   : > { %v766_v0 = vmul.f32 0.17677669, %v759_v63  ;;  %v1449_v1 = vpop.f32.mrb[9].mxu1  ;;  %v792_v63 = vunpack.c.l.bf16 %v1655_v29 }
 0x1e5   : > { %v762_v3 = vpop.f32.mrb[10].mxu1 }
 0x1e6   : > { %v767_v4 = vmul.f32 0.17677669, %v762_v3  ;;  %v1450_v7 = vpop.f32.mrb[11].mxu1  ;;  %v769_v8 = vsel %vm768_vm2, %v766_v0, -inf }
 0x1e7   : > { %770 = vmax.xlane.f32.xlu0 %v769_v8 }
 0x1e8   : > { %v773_v9 = vsel %vm772_vm3, %v767_v4, -inf }
 0x1eb   : > { %774 = vmax.xlane.f32.xlu0 %v773_v9 }
 0x274   : > { %v771_v21 = vpop.xlane.xlu0 %770 }
 0x275   : > { %v776_v22 = vsub.f32 %v766_v0, %v771_v21  ;;  %v793_v0 = vunpack.c.l.bf16 %v1657_v30 }
 0x277   : > { %v778_v23 = vmul.f32 1.442695, %v776_v22 }
 0x278   : > { %v775_v26 = vpop.xlane.xlu0 %774 }
 0x279   : > { %1520 = vpow2.f32 %v778_v23  ;;  %v777_v27 = vsub.f32 %v767_v4, %v775_v26 }
 0x27b   : > { %v780_v28 = vmul.f32 1.442695, %v777_v27 }
 0x27d   : > { %1522 = vpow2.f32 %v780_v28 }
 0x283   : > { %v1521_v31 = vpop.eup %1520 }
 0x284   : > { %v782_v32 = vsel %vm768_vm2, %v1521_v31, 0.0 }
 0x285   : > { %783 = vadd.xlane.f32.xlu1 %v782_v32  ;;  %v1024_v32 = vunpack.c.l.bf16 %v1632_v10 }
 0x287   : > { %v1523_v33 = vpop.eup %1522 }
 0x288   : > { %v785_v34 = vsel %vm772_vm3, %v1523_v33, 0.0 }
 0x289   : > { %786 = vadd.xlane.f32.xlu1 %v785_v34  ;;  %v1025_v34 = vunpack.c.l.bf16 %v1634_v11 }
 0x312   : > { %v784_v40 = vpop.xlane.xlu1 %783 }
 0x313   : > { %1524 = vrcp.f32 %v784_v40 }
 0x316   : > { %v787_v41 = vpop.xlane.xlu1 %786 }
 0x317   : > { %1526 = vrcp.f32 %v787_v41 }
 0x31d   : > { %v1525_v42 = vpop.eup %1524 }
 0x31e   : > { %v790_v44 = vmul.f32 %v1525_v42, %v1521_v31 }
 0x321   : > { %v1527_v43 = vpop.eup %1526 }
 0x322   : > { %v791_v46 = vmul.f32 %v1527_v43, %v1523_v33  ;;  %v1022_v33 = vunpack.c.l.bf16 %v1626_v5  ;;  %v1028_v43 = vunpack.c.l.bf16 %v1651_v24 }
 0x324   : > { %v794_v50 = vpack.c.bf16 %v791_v46, %v790_v44  ;;  %v1026_v46 = vunpack.c.l.bf16 %v1637_v15 }
 0x326   : > { %922 = vxpose.xlu0.c.b16.start.end [1/1] (short) (narrow) %v794_v50, 64  ;;  %1460 = vmatmul.mubr.msk.bf16.vlgmr.msra.gmra.mrb[12].mxu0 %vm768_vm2, %v794_v50 }
 0x327   : > { %1464 = vmatpush3.bf16.msra.mxu0 %v1516_v47  ;;  %1467 = vmatprep.mubr.msk.bf16.mxu0 %vm1537_vm1, %v1536_v2  ;;  %v1029_v47 = vunpack.c.l.bf16 %v1653_v25 }
 0x328   : > { %1465 = vmatprep.subr.bf16.mxu0 %v1536_v2 }
 0x32b   : > { %1466 = vmatpush3.bf16.msra.mxu0 %v1517_v52 }
 0x32c   : > { %1471 = vmatprep.subr.bf16.mxu0 %v955_v53 }
 0x38c   : > { %v930_v54 = vpop.trf.xlu0 }
 0x390   : > { %v931_v60 = vpop.trf.xlu0 }
 0x394   : > { %v932_v61 = vpop.trf.xlu0 }
 0x398   : > { %v933_v2 = vpop.trf.xlu0 }
 0x3f9   : > { %v836_v55 = vpop.f32.mrb[12].mxu0 }
 0x3fa   : > { %v1461_v56 = vpop.f32.mrb[13].mxu0 }
 0x3fb   : > { %v839_v57 = vpop.f32.mrb[14].mxu0 }
 0x3fc   : > { %v847_v58 = vpack.c.bf16 %v839_v57, %v836_v55  ;;  %v1462_v59 = vpop.f32.mrb[15].mxu0 }
 0x3fe   : > { %1468 = vmatmul.mubr.msk.bf16.vlgmr.msra.gmra.mrb[16].mxu0 %vm426_vm0, %v847_v58 }
 0x3ff   : > { %1472 = vmatpush3.bf16.msra.mxu0 %v955_v53  ;;  %1473 = vmatprep.mubr.msk.bf16.mxu0 %vm938_vm6, %v930_v54 }
 0x406   : > { %1474 = vmatmul.mubr.msk.bf16.vlgmr.msra.gmra.mrb[20].mxu0 %vm938_vm6, %v931_v60 }
 0x407   : > { %1477 = vmatprep.mubr.msk.bf16.mxu0 %vm938_vm6, %v932_v61 }
 0x40e   : > { %1478 = vmatmul.mubr.msk.bf16.gmra.mrb[24].mxu0 %vm938_vm6, %v933_v2 }
 0x4d1   : > { %v897_v1 = vpop.f32.mrb[16].mxu0 }
 0x4d2   : > { %v904_v3 = vadd.f32 %v897_v1, %v792_v63  ;;  %v1469_v4 = vpop.f32.mrb[17].mxu0 }
 0x4d3   : > { %v900_v7 = vpop.f32.mrb[18].mxu0 }
 0x4d4   : > { %v1358_v8 = vpack.c.bf16 %v904_v3, %v904_v3  ;;  %v905_v9 = vadd.f32 %v900_v7, %v793_v0  ;;  %v1470_v12 = vpop.f32.mrb[19].mxu0 }
 0x4d6   : > { %915 = vst.msk [vmem:[%s380_s27] sm:$0xf] %vm914_vm9, %v1358_v8  ;;  %v1359_v29 = vpack.c.bf16 %v905_v9, %v905_v9 }
 0x4d8   : > { %v920_v30 = vsel %vm918_vm10, %v1359_v29, %v919_v13 }
 0x4d9   : > { %921 = vst [vmem:[%s380_s27 + $0x4] sm:$0x1] %v920_v30  ;;  %v1475_v14 = vpop.f32.mrb[20].mxu0 }
 0x4da   : > { %v991_v16 = vpop.f32.mrb[21].mxu0 }
 0x4db   : > { %v1476_v17 = vpop.f32.mrb[22].mxu0 }
 0x4dc   : > { %v1035_v19 = vpack.c.bf16 %v1476_v17, %v1475_v14  ;;  %v994_v20 = vpop.f32.mrb[23].mxu0 }
 0x4dd   : > { %v1034_v21 = vpack.c.bf16 %v994_v20, %v991_v16 }
 0x4df   : > { %1485 = vmatprep.mubr.msk.bf16.mxu1 %vm426_vm0, %v1034_v21 }
 0x4e0   : > { %1486 = vmatmul.mubr.msk.bf16.vlgmr.msra.gmra.mrb[12].mxu1 %vm426_vm0, %v1035_v19 }
 0x4e1   : > { %v1479_v22 = vpop.f32.mrb[24].mxu0 }
 0x4e2   : > { %v1007_v23 = vpop.f32.mrb[25].mxu0 }
 0x4e3   : > { %v1480_v26 = vpop.f32.mrb[26].mxu0 }
 0x4e4   : > { %v1037_v27 = vpack.c.bf16 %v1480_v26, %v1479_v22  ;;  %v1010_v28 = vpop.f32.mrb[27].mxu0 }
 0x4e5   : > { %v1036_v31 = vpack.c.bf16 %v1010_v28, %v1007_v23 }
 0x4e7   : > { %1489 = vmatprep.mubr.msk.bf16.mxu1 %vm426_vm0, %v1036_v31 }
 0x4e8   : > { %1490 = vmatmul.mubr.msk.bf16.gmra.mrb[16].mxu1 %vm426_vm0, %v1037_v27 }
 0x5b3   : > { %v1487_v35 = vpop.f32.mrb[12].mxu1 }
 0x5b4   : > { %v1129_v37 = vadd.f32 %v1487_v35, %v1024_v32  ;;  %v1096_v38 = vpop.f32.mrb[13].mxu1 }
 0x5b5   : > { %v1127_v39 = vadd.f32 %v1096_v38, %v1022_v33  ;;  %v1488_v10 = vpop.f32.mrb[14].mxu1 }
 0x5b6   : > { %v1362_v40 = vpack.c.bf16 %v1129_v37, %v1129_v37  ;;  %v1130_v5 = vadd.f32 %v1488_v10, %v1025_v34  ;;  %v1099_v41 = vpop.f32.mrb[15].mxu1 }
 0x5b7   : > { %v1360_v11 = vpack.c.bf16 %v1127_v39, %v1127_v39  ;;  %v1128_v42 = vadd.f32 %v1099_v41, %v1023_v36 }
 0x5b8   : > { %1169 = vst.msk [vmem:[%s1748_s28 + $0x8] sm:$0xf] %vm914_vm9, %v1362_v40  ;;  %v1363_v6 = vpack.c.bf16 %v1130_v5, %v1130_v5 }
 0x5b9   : > { %1167 = vst.msk [vmem:[%s1748_s28] sm:$0xf] %vm914_vm9, %v1360_v11  ;;  %v1361_v44 = vpack.c.bf16 %v1128_v42, %v1128_v42 }
 0x5ba   : > { %1170 = vst.msk [vmem:[%s1748_s28 + $0xc] sm:$0xf] %vm914_vm9, %v1363_v6 }
 0x5bb   : > { %1168 = vst.msk [vmem:[%s1748_s28 + $0x4] sm:$0xf] %vm914_vm9, %v1361_v44  ;;  %v1491_v48 = vpop.f32.mrb[16].mxu1 }
 0x5bc   : > { %v1133_v50 = vadd.f32 %v1491_v48, %v1028_v43  ;;  %v1112_v24 = vpop.f32.mrb[17].mxu1 }
 0x5bd   : > { %v1131_v51 = vadd.f32 %v1112_v24, %v1026_v46  ;;  %v1492_v52 = vpop.f32.mrb[18].mxu1 }
 0x5be   : > { %v1366_v53 = vpack.c.bf16 %v1133_v50, %v1133_v50  ;;  %v1134_v54 = vadd.f32 %v1492_v52, %v1029_v47  ;;  %v1115_v55 = vpop.f32.mrb[19].mxu1 }
 0x5bf   : > { %v1364_v15 = vpack.c.bf16 %v1131_v51, %v1131_v51  ;;  %v1132_v56 = vadd.f32 %v1115_v55, %v1027_v49 }
 0x5c0   : > { %1173 = vst.msk [vmem:[%s1748_s28 + $0x18] sm:$0xf] %vm914_vm9, %v1366_v53  ;;  %v1367_v57 = vpack.c.bf16 %v1134_v54, %v1134_v54 }
 0x5c1   : > { %1171 = vst.msk [vmem:[%s1748_s28 + $0x10] sm:$0xf] %vm914_vm9, %v1364_v15  ;;  %v1365_v25 = vpack.c.bf16 %v1132_v56, %v1132_v56 }
 0x5c2   : > { %1174 = vst.msk [vmem:[%s1748_s28 + $0x1c] sm:$0xf] %vm914_vm9, %v1367_v57 }
 0x5c3   : > { %1172 = vst.msk [vmem:[%s1748_s28 + $0x14] sm:$0xf] %vm914_vm9, %v1365_v25 }
 0x5c4 PF: > { %s20_s30 = sadd.s32 1, %s1534_s30  }
 0x5c5   : > { %p17_p4 = scmp.ge.s32.totalorder %s20_s30, 4  }
 0x5c7   :  { %19 = sbr.rel (!%p17_p4) target bundleno = 1 (0x1), region = 100 }

</bundles_post_ra>
